<compile_context>
chip_gen: v6e
topology: v6e:2x2x1
jax: 0.10.0
libtpu: 0.0.40
codegen_flags: <defaults>
</compile_context>

<pallas_src>
import math
import functools

import jax
import jax.numpy as jnp
from jax.experimental import pallas as pl
from jax.experimental.pallas import tpu as pltpu

_INV_SQRT2 = 1.0 / math.sqrt(2.0)


def _round_up(x, m):
    return (x + m - 1) // m * m


def _gelu_exact(h):
    # exact erf-based GELU (matches torch.nn.functional.gelu default)
    return 0.5 * h * (1.0 + jax.lax.erf(h * _INV_SQRT2))


# -----------------------------------------------------------------------------
# Kernel A: weight-resident fast path (full w1/w2 live in VMEM, 1-D token grid)
# -----------------------------------------------------------------------------
def _mlp_kernel_resident(x_ref, w1_ref, b1_ref, w2_ref, b2_ref, o_ref):
    # x_ref : (tm, Hp)     token tile (native dtype)
    # w1_ref: (Hp, Dp)     full fc1 weight ([in, out] layout), VMEM-resident
    # b1_ref: (1, Dp)      fc1 bias
    # w2_ref: (Dp, Hp)     full fc2 weight, VMEM-resident
    # b2_ref: (1, Hp)      fc2 bias
    # o_ref : (tm, Hp)     output tile
    h = jnp.dot(x_ref[...], w1_ref[...], preferred_element_type=jnp.float32)
    h = _gelu_exact(h + b1_ref[...].astype(jnp.float32))
    # TODO(synk): dropout is identity here (inference mode); training-time
    # dropout would draw a mask with pltpu.prng_seed / pltpu.prng_random_bits.
    y = jnp.dot(h.astype(w2_ref.dtype), w2_ref[...],
                preferred_element_type=jnp.float32)
    o_ref[...] = (y + b2_ref[...].astype(jnp.float32)).astype(o_ref.dtype)


# -----------------------------------------------------------------------------
# Kernel B: streamed path (mlp_dim D tiled as an innermost "arbitrary" axis)
# -----------------------------------------------------------------------------
def _mlp_kernel_streamed(x_ref, w1_ref, b1_ref, w2_ref, b2_ref, o_ref, acc_ref):
    # x_ref : (tm, Hp)   token tile
    # w1_ref: (Hp, td)   fc1 weight D-slice
    # b1_ref: (1, td)    fc1 bias D-slice
    # w2_ref: (td, Hp)   fc2 weight D-slice
    # b2_ref: (1, Hp)    fc2 bias
    # o_ref : (tm, Hp)   output tile (same block across the D axis)
    # acc_ref: (tm, Hp)  f32 accumulator scratch (persists across the D axis)
    j = pl.program_id(1)

    @pl.when(j == 0)
    def _():
        # Fold the fc2 bias into the accumulator init (saves an epilogue add).
        acc_ref[...] = jnp.broadcast_to(
            b2_ref[...].astype(jnp.float32), acc_ref.shape)

    h = jnp.dot(x_ref[...], w1_ref[...], preferred_element_type=jnp.float32)
    h = _gelu_exact(h + b1_ref[...].astype(jnp.float32))
    # TODO(synk): dropout is identity here (inference mode).
    acc_ref[...] += jnp.dot(h.astype(w2_ref.dtype), w2_ref[...],
                            preferred_element_type=jnp.float32)

    @pl.when(j == pl.num_programs(1) - 1)
    def _():
        o_ref[...] = acc_ref[...].astype(o_ref.dtype)


# -----------------------------------------------------------------------------
# Config selection helpers
# -----------------------------------------------------------------------------
def _vmem_budget_bytes():
    """(budget, physical_capacity). Budget leaves ~20% headroom for the compiler."""
    cap = 64 * 1024 * 1024  # safe default (v7x per-TC VMEM)
    try:
        info = pltpu.get_tpu_info()
        cap_q = int(getattr(info, "vmem_capacity_bytes", 0) or 0)
        if cap_q > 0:
            cap = cap_q
    except Exception:
        pass
    budget = max(16 * 1024 * 1024, int(cap * 0.8))
    return budget, cap


def _resident_footprint(tm, H_pad, D_pad, itemsize):
    return (2 * (2 * H_pad * D_pad + D_pad + H_pad) * itemsize  # w1,w2,b1,b2 (dbl-buf)
            + 4 * tm * H_pad * itemsize                          # x + out tiles (dbl-buf)
            + 2 * tm * D_pad * 4)                                # f32 intermediate headroom


def _streamed_footprint(tm, td, H_pad, itemsize):
    return (4 * tm * H_pad * itemsize                            # x + out tiles (dbl-buf)
            + 2 * (2 * H_pad * td + td + H_pad) * itemsize       # w1/w2 slices + biases
            + tm * H_pad * 4                                     # f32 accumulator scratch
            + 2 * tm * td * 4)                                   # f32 intermediate headroom


# -----------------------------------------------------------------------------
# Forward wrapper
# -----------------------------------------------------------------------------
@functools.partial(jax.jit, static_argnames=("tm", "td", "force_streamed"))
def mlp_forward(x, w1, b1, w2, b2, *, tm=None, td=None, force_streamed=False):
    """x: [B, S, H]; w1: [H, D] (fc1.weight^T); b1: [D]; w2: [D, H]; b2: [H]."""
    B, S, H = x.shape
    D = w1.shape[1]
    M = B * S
    itemsize = jnp.dtype(x.dtype).itemsize

    # Lane-dense / MXU-friendly padding.
    H_pad = _round_up(H, 128)
    D_pad = _round_up(D, 128)
    M_pad = _round_up(max(M, 1), 128)

    budget, cap = _vmem_budget_bytes()

    # --- token-tile candidates -------------------------------------------------
    if tm is not None:
        tm_candidates = [tm]
    else:
        # Ensure >=2 token blocks whenever possible so the "parallel" axis can
        # be sharded across both TensorCores on v7x.
        if M_pad >= 256:
            tm_cap = max(128, (M_pad // 2) // 128 * 128)
        else:
            tm_cap = M_pad
        tm_candidates = [c for c in (1024, 768, 512, 384, 256, 128) if c <= tm_cap]
        if not tm_candidates:
            tm_candidates = [128]

    if td is not None:
        td_candidates = [td]
    else:
        td_candidates = [c for c in (512, 256, 128) if c <= D_pad] or [128]

    # --- choose path + tiles ----------------------------------------------------
    mode = None
    tm_sel = tm_candidates[-1]
    td_sel = td_candidates[-1]

    weights_resident_bytes = 2 * (2 * H_pad * D_pad + D_pad + H_pad) * itemsize
    if (not force_streamed) and weights_resident_bytes <= budget // 2:
        for tm_c in tm_candidates:                 # largest tm that fits
            if _resident_footprint(tm_c, H_pad, D_pad, itemsize) <= budget:
                mode, tm_sel, td_sel = "resident", tm_c, D_pad
                break

    if mode is None:
        mode = "streamed"
        found = False
        for tm_c in tm_candidates:                 # maximize tm first (roofline)
            for td_c in td_candidates:             # then the largest td that fits
                if _streamed_footprint(tm_c, td_c, H_pad, itemsize) <= budget:
                    tm_sel, td_sel = tm_c, td_c
                    found = True
                    break
            if found:
                break
        # TODO(synk): for extremely large H on v7x an output-H tiling (grid
        # (i, n, j) with a (tm, tn) accumulator) would free more VMEM for tm.

    if mode == "resident":
        fp = _resident_footprint(tm_sel, H_pad, D_pad, itemsize)
    else:
        fp = _streamed_footprint(tm_sel, td_sel, H_pad, itemsize)
    vmem_limit = int(min(max(budget, fp + (4 << 20)), cap))

    # --- pad operands ------------------------------------------------------------
    M_pad = _round_up(M_pad, tm_sel)
    if mode == "streamed":
        D_pad = _round_up(D_pad, td_sel)

    x2 = jnp.pad(x.reshape(M, H), ((0, M_pad - M), (0, H_pad - H)))
    w1p = jnp.pad(w1, ((0, H_pad - H), (0, D_pad - D)))
    b1p = jnp.pad(b1, (0, D_pad - D)).reshape(1, D_pad)
    w2p = jnp.pad(w2, ((0, D_pad - D), (0, H_pad - H)))
    b2p = jnp.pad(b2, (0, H_pad - H)).reshape(1, H_pad)
    # TODO(synk): if the accuracy contract allows, cast x2/w1p/w2p to bf16 here
    # (f32 accumulation kept) to halve HBM traffic and double MXU throughput.

    if mode == "resident":
        out = pl.pallas_call(
            _mlp_kernel_resident,
            out_shape=jax.ShapeDtypeStruct((M_pad, H_pad), x.dtype),
            grid_spec=pltpu.PrefetchScalarGridSpec(
                num_scalar_prefetch=0,
                grid=(M_pad // tm_sel,),
                in_specs=[
                    pl.BlockSpec((tm_sel, H_pad), lambda i: (i, 0)),   # x tile
                    pl.BlockSpec((H_pad, D_pad), lambda i: (0, 0)),    # w1 (resident)
                    pl.BlockSpec((1, D_pad), lambda i: (0, 0)),        # b1
                    pl.BlockSpec((D_pad, H_pad), lambda i: (0, 0)),    # w2 (resident)
                    pl.BlockSpec((1, H_pad), lambda i: (0, 0)),        # b2
                ],
                out_specs=pl.BlockSpec((tm_sel, H_pad), lambda i: (i, 0)),
            ),
            compiler_params=pltpu.CompilerParams(
                dimension_semantics=("parallel",),
                vmem_limit_bytes=vmem_limit,
            ),
        )(x2, w1p, b1p, w2p, b2p)
    else:
        out = pl.pallas_call(
            _mlp_kernel_streamed,
            out_shape=jax.ShapeDtypeStruct((M_pad, H_pad), x.dtype),
            grid_spec=pltpu.PrefetchScalarGridSpec(
                num_scalar_prefetch=0,
                grid=(M_pad // tm_sel, D_pad // td_sel),
                in_specs=[
                    pl.BlockSpec((tm_sel, H_pad), lambda i, j: (i, 0)),   # x tile
                    pl.BlockSpec((H_pad, td_sel), lambda i, j: (0, j)),   # w1 D-slice
                    pl.BlockSpec((1, td_sel), lambda i, j: (0, j)),       # b1 D-slice
                    pl.BlockSpec((td_sel, H_pad), lambda i, j: (j, 0)),   # w2 D-slice
                    pl.BlockSpec((1, H_pad), lambda i, j: (0, 0)),        # b2
                ],
                out_specs=pl.BlockSpec((tm_sel, H_pad), lambda i, j: (i, 0)),
                scratch_shapes=[pltpu.VMEM((tm_sel, H_pad), jnp.float32)],
            ),
            compiler_params=pltpu.CompilerParams(
                dimension_semantics=("parallel", "arbitrary"),
                vmem_limit_bytes=vmem_limit,
            ),
        )(x2, w1p, b1p, w2p, b2p)

    return out[:M, :H].reshape(B, S, H)


def xavier_uniform(key, fan_in, fan_out, dtype=jnp.float32):
    limit = math.sqrt(6.0 / (fan_in + fan_out))
    # stored as [in, out] so the kernel computes x @ W
    return jax.random.uniform(key, (fan_in, fan_out), dtype, minval=-limit, maxval=limit)


if __name__ == "__main__":
    # Small config consistent with the module: hidden_size=32, mlp_dim=128
    B, S, H, D = 2, 8, 32, 128

    key = jax.random.PRNGKey(0)
    kx, kw1, kb1, kw2, kb2 = jax.random.split(key, 5)

    x = jax.random.normal(kx, (B, S, H), jnp.float32)
    w1 = xavier_uniform(kw1, H, D)                         # fc1.weight^T
    b1 = 1e-6 * jax.random.normal(kb1, (D,), jnp.float32)
    w2 = xavier_uniform(kw2, D, H)                         # fc2.weight^T
    b2 = 1e-6 * jax.random.normal(kb2, (H,), jnp.float32)

    # plain-JAX reference
    h_ref = x.reshape(-1, H) @ w1 + b1
    h_ref = 0.5 * h_ref * (1.0 + jax.lax.erf(h_ref / math.sqrt(2.0)))
    y_ref = (h_ref @ w2 + b2).reshape(B, S, H)

    # weight-resident fast path (default at these shapes)
    y_fast = mlp_forward(x, w1, b1, w2, b2)
    jax.block_until_ready(y_fast)
    assert jnp.allclose(y_fast, y_ref, atol=1e-5, rtol=1e-5), "resident path mismatch"

    # streamed (D-tiled) path, exercised explicitly for coverage
    y_stream = mlp_forward(x, w1, b1, w2, b2, force_streamed=True)
    jax.block_until_ready(y_stream)
    assert jnp.allclose(y_stream, y_ref, atol=1e-5, rtol=1e-5), "streamed path mismatch"

    print("KERNEL_OK")
</pallas_src>

<mosaic_0001>
module attributes {stable_mosaic.version = 11 : i64} {
  func.func @_mlp_kernel_resident(%arg0: i32, %arg1: memref<128x128xf32, #tpu.memory_space<vmem>>, %arg2: memref<128x128xf32, #tpu.memory_space<vmem>>, %arg3: memref<1x128xf32, #tpu.memory_space<vmem>>, %arg4: memref<128x128xf32, #tpu.memory_space<vmem>>, %arg5: memref<1x128xf32, #tpu.memory_space<vmem>>, %arg6: memref<128x128xf32, #tpu.memory_space<vmem>>) attributes {dimension_semantics = [#tpu.dimension_semantics<parallel>], iteration_bounds = array<i64: 1>, scalar_prefetch = 0 : i64, scratch_operands = 0 : i64, tpu.core_type = #tpu.core_type<tc>, window_params = [{transform_indices = @transform_0, window_bounds = array<i64: 128, 128>}, {pipeline_mode = #tpu.pipeline_mode<synchronous>, transform_indices = @transform_1, window_bounds = array<i64: 128, 128>}, {pipeline_mode = #tpu.pipeline_mode<synchronous>, transform_indices = @transform_2, window_bounds = array<i64: 1, 128>}, {pipeline_mode = #tpu.pipeline_mode<synchronous>, transform_indices = @transform_3, window_bounds = array<i64: 128, 128>}, {pipeline_mode = #tpu.pipeline_mode<synchronous>, transform_indices = @transform_4, window_bounds = array<i64: 1, 128>}, {transform_indices = @transform_5, window_bounds = array<i64: 128, 128>}]} {
    %c0 = arith.constant 0 : index
    %c0_0 = arith.constant 0 : index
    %0 = vector.load %arg1[%c0, %c0_0] : memref<128x128xf32, #tpu.memory_space<vmem>>, vector<128x128xf32>
    %c0_1 = arith.constant 0 : index
    %c0_2 = arith.constant 0 : index
    %1 = vector.load %arg2[%c0_1, %c0_2] : memref<128x128xf32, #tpu.memory_space<vmem>>, vector<128x128xf32>
    %cst = arith.constant dense<0.000000e+00> : vector<128x128xf32>
    %2 = tpu.matmul %0, %1, %cst {dimension_numbers = #tpu.dot_dimension_numbers<[1], [0], [0], [1], [0, 0, 1, 1], [], []>} : vector<128x128xf32>, vector<128x128xf32>, vector<128x128xf32> -> vector<128x128xf32>
    %c0_3 = arith.constant 0 : index
    %c0_4 = arith.constant 0 : index
    %3 = vector.load %arg3[%c0_3, %c0_4] : memref<1x128xf32, #tpu.memory_space<vmem>>, vector<1x128xf32>
    %4 = vector.broadcast %3 : vector<1x128xf32> to vector<128x128xf32>
    %5 = arith.addf %2, %4 : vector<128x128xf32>
    %cst_5 = arith.constant 5.000000e-01 : f32
    %6 = vector.broadcast %cst_5 : f32 to vector<128x128xf32>
    %7 = arith.mulf %6, %5 : vector<128x128xf32>
    %cst_6 = arith.constant 0.707106769 : f32
    %8 = vector.broadcast %cst_6 : f32 to vector<128x128xf32>
    %9 = arith.mulf %5, %8 : vector<128x128xf32>
    %10 = math.erf %9 : vector<128x128xf32>
    %cst_7 = arith.constant 1.000000e+00 : f32
    %11 = vector.broadcast %cst_7 : f32 to vector<128x128xf32>
    %12 = arith.addf %11, %10 : vector<128x128xf32>
    %13 = arith.mulf %7, %12 : vector<128x128xf32>
    %c0_8 = arith.constant 0 : index
    %c0_9 = arith.constant 0 : index
    %14 = vector.load %arg4[%c0_8, %c0_9] : memref<128x128xf32, #tpu.memory_space<vmem>>, vector<128x128xf32>
    %cst_10 = arith.constant dense<0.000000e+00> : vector<128x128xf32>
    %15 = tpu.matmul %13, %14, %cst_10 {dimension_numbers = #tpu.dot_dimension_numbers<[1], [0], [0], [1], [0, 0, 1, 1], [], []>} : vector<128x128xf32>, vector<128x128xf32>, vector<128x128xf32> -> vector<128x128xf32>
    %c0_11 = arith.constant 0 : index
    %c0_12 = arith.constant 0 : index
    %16 = vector.load %arg5[%c0_11, %c0_12] : memref<1x128xf32, #tpu.memory_space<vmem>>, vector<1x128xf32>
    %17 = vector.broadcast %16 : vector<1x128xf32> to vector<128x128xf32>
    %18 = arith.addf %15, %17 : vector<128x128xf32>
    %c0_13 = arith.constant 0 : index
    %c0_14 = arith.constant 0 : index
    %19 = vector.load %arg6[%c0_13, %c0_14] : memref<128x128xf32, #tpu.memory_space<vmem>>, vector<128x128xf32>
    tpu.vector_store %arg6[%c0_13, %c0_14], %18 {strides = array<i32>} : memref<128x128xf32, #tpu.memory_space<vmem>>, vector<128x128xf32>,
    return
  }
  func.func @transform_0(%arg0: i32) -> (i32, i32) {
    %c0_i32 = arith.constant 0 : i32
    %c0_i32_0 = arith.constant 0 : i32
    return %arg0, %c0_i32 : i32, i32
  }
  func.func @transform_1(%arg0: i32) -> (i32, i32) {
    %c0_i32 = arith.constant 0 : i32
    %c0_i32_0 = arith.constant 0 : i32
    %c0_i32_1 = arith.constant 0 : i32
    return %c0_i32, %c0_i32_0 : i32, i32
  }
  func.func @transform_2(%arg0: i32) -> (i32, i32) {
    %c0_i32 = arith.constant 0 : i32
    %c0_i32_0 = arith.constant 0 : i32
    %c0_i32_1 = arith.constant 0 : i32
    return %c0_i32, %c0_i32_0 : i32, i32
  }
  func.func @transform_3(%arg0: i32) -> (i32, i32) {
    %c0_i32 = arith.constant 0 : i32
    %c0_i32_0 = arith.constant 0 : i32
    %c0_i32_1 = arith.constant 0 : i32
    return %c0_i32, %c0_i32_0 : i32, i32
  }
  func.func @transform_4(%arg0: i32) -> (i32, i32) {
    %c0_i32 = arith.constant 0 : i32
    %c0_i32_0 = arith.constant 0 : i32
    %c0_i32_1 = arith.constant 0 : i32
    return %c0_i32, %c0_i32_0 : i32, i32
  }
  func.func @transform_5(%arg0: i32) -> (i32, i32) {
    %c0_i32 = arith.constant 0 : i32
    %c0_i32_0 = arith.constant 0 : i32
    return %arg0, %c0_i32 : i32, i32
  }
}

</mosaic_0001>

<bundles_post_ra>
// kernel: mlp_forward.1
= control target key start
LH: loop header
LB: loop body
LE: loop exit
PB: predicated region body
PF: predicated region fallthrough
CT: control target
= control target key end

     0   :  { %s948_s1 = inlined_call_operand.vmem [shape: f32[128,128], index: 1, kind: input, shape index: {}]   ;;  %s949_s0 = inlined_call_operand.vmem [shape: f32[128,128], index: 0, kind: input, shape index: {}]   ;;  %s950_s3 = inlined_call_operand.vmem [shape: f32[128,128], index: 3, kind: input, shape index: {}]   ;;  %s951_s2 = inlined_call_operand.vmem [shape: f32[1,128], index: 2, kind: input, shape index: {}]   ;;  %s952_s4 = inlined_call_operand.vmem [shape: f32[1,128], index: 4, kind: input, shape index: {}]   ;;  %s953_s5 = inlined_call_operand.vmem [shape: f32[128,128], index: 5, kind: output, shape index: {}]  }
   0x1   :  { %v51_v0 = vld [vmem:[%s948_s1 + $0x78] sm:$0xff]  ;;  %v50_v1 = vld [vmem:[%s948_s1 + $0x70] sm:$0xff]  ;;  %v49_v2 = vld [vmem:[%s948_s1 + $0x68] sm:$0xff] }
   0x2   :  { %538 = vmatprep.subr.mxu0 %v51_v0  ;;  %v48_v3 = vld [vmem:[%s948_s1 + $0x60] sm:$0xff]  ;;  %v47_v5 = vld [vmem:[%s948_s1 + $0x58] sm:$0xff]  ;;  %v46_v6 = vld [vmem:[%s948_s1 + $0x50] sm:$0xff] }
   0x3   :  { %539 = vmatpush3.msra.mxu0 %v51_v0  ;;  %v20_v4 = vld [vmem:[%s949_s0] sm:$0xff]  ;;  %v45_v7 = vld [vmem:[%s948_s1 + $0x48] sm:$0xff]  ;;  %v299_v8 = vld [vmem:[%s950_s3 + $0x78] sm:$0xff] }
   0x4   :  { %540 = vmatprep.subr.mxu0 %v50_v1  ;;  %570 = vmatprep.mubr.f32.mxu0 %v20_v4  ;;  %v298_v9 = vld [vmem:[%s950_s3 + $0x70] sm:$0xff]  ;;  %v44_v10 = vld [vmem:[%s948_s1 + $0x40] sm:$0xff]  ;;  %v297_v11 = vld [vmem:[%s950_s3 + $0x68] sm:$0xff] }
   0x5   :  { %541 = vmatpush3.msra.mxu0 %v50_v1  ;;  %594 = vmatprep.subr.mxu1 %v299_v8  ;;  %v43_v12 = vld [vmem:[%s948_s1 + $0x38] sm:$0xff]  ;;  %v42_v13 = vld [vmem:[%s948_s1 + $0x30] sm:$0xff]  ;;  %v41_v14 = vld [vmem:[%s948_s1 + $0x28] sm:$0xff] }
   0x6   :  { %542 = vmatprep.subr.mxu0 %v49_v2  ;;  %595 = vmatpush3.msra.mxu1 %v299_v8  ;;  %v40_v15 = vld [vmem:[%s948_s1 + $0x20] sm:$0xff]  ;;  %v39_v16 = vld [vmem:[%s948_s1 + $0x18] sm:$0xff]  ;;  %v38_v17 = vld [vmem:[%s948_s1 + $0x10] sm:$0xff] }
   0x7   :  { %543 = vmatpush3.msra.mxu0 %v49_v2  ;;  %596 = vmatprep.subr.mxu1 %v298_v9  ;;  %v37_v18 = vld [vmem:[%s948_s1 + $0x8] sm:$0xff]  ;;  %v36_v19 = vld [vmem:[%s948_s1] sm:$0xff]  ;;  %v22_v21 = vld [vmem:[%s949_s0 + $0x10] sm:$0xff] }
   0x8   :  { %544 = vmatprep.subr.mxu0 %v48_v3  ;;  %597 = vmatpush3.msra.mxu1 %v298_v9  ;;  %v21_v20 = vld [vmem:[%s949_s0 + $0x8] sm:$0xff]  ;;  %v23_v22 = vld [vmem:[%s949_s0 + $0x18] sm:$0xff]  ;;  %v24_v23 = vld [vmem:[%s949_s0 + $0x20] sm:$0xff] }
   0x9   :  { %545 = vmatpush3.msra.mxu0 %v48_v3  ;;  %598 = vmatprep.subr.mxu1 %v297_v11  ;;  %v25_v24 = vld [vmem:[%s949_s0 + $0x28] sm:$0xff]  ;;  %v26_v25 = vld [vmem:[%s949_s0 + $0x30] sm:$0xff]  ;;  %v27_v26 = vld [vmem:[%s949_s0 + $0x38] sm:$0xff] }
   0xa   :  { %546 = vmatprep.subr.mxu0 %v47_v5  ;;  %599 = vmatpush3.msra.mxu1 %v297_v11  ;;  %v28_v27 = vld [vmem:[%s949_s0 + $0x40] sm:$0xff]  ;;  %v29_v28 = vld [vmem:[%s949_s0 + $0x48] sm:$0xff]  ;;  %v30_v29 = vld [vmem:[%s949_s0 + $0x50] sm:$0xff] }
   0xb   :  { %547 = vmatpush3.msra.mxu0 %v47_v5  ;;  %v31_v30 = vld [vmem:[%s949_s0 + $0x58] sm:$0xff]  ;;  %v32_v31 = vld [vmem:[%s949_s0 + $0x60] sm:$0xff]  ;;  %v33_v32 = vld [vmem:[%s949_s0 + $0x68] sm:$0xff] }
   0xc   :  { %548 = vmatprep.subr.mxu0 %v46_v6  ;;  %v34_v33 = vld [vmem:[%s949_s0 + $0x70] sm:$0xff]  ;;  %v35_v34 = vld [vmem:[%s949_s0 + $0x78] sm:$0xff]  ;;  %v296_v35 = vld [vmem:[%s950_s3 + $0x60] sm:$0xff] }
   0xd   :  { %549 = vmatpush3.msra.mxu0 %v46_v6  ;;  %600 = vmatprep.subr.mxu1 %v296_v35  ;;  %v295_v36 = vld [vmem:[%s950_s3 + $0x58] sm:$0xff]  ;;  %v294_v37 = vld [vmem:[%s950_s3 + $0x50] sm:$0xff]  ;;  %v293_v38 = vld [vmem:[%s950_s3 + $0x48] sm:$0xff] }
   0xe   :  { %550 = vmatprep.subr.mxu0 %v45_v7  ;;  %601 = vmatpush3.msra.mxu1 %v296_v35  ;;  %v292_v39 = vld [vmem:[%s950_s3 + $0x40] sm:$0xff]  ;;  %v291_v40 = vld [vmem:[%s950_s3 + $0x38] sm:$0xff]  ;;  %v290_v41 = vld [vmem:[%s950_s3 + $0x30] sm:$0xff] }
   0xf   :  { %551 = vmatpush3.msra.mxu0 %v45_v7  ;;  %602 = vmatprep.subr.mxu1 %v295_v36  ;;  %v289_v42 = vld [vmem:[%s950_s3 + $0x28] sm:$0xff]  ;;  %v288_v43 = vld [vmem:[%s950_s3 + $0x20] sm:$0xff]  ;;  %v287_v44 = vld [vmem:[%s950_s3 + $0x18] sm:$0xff] }
  0x10   :  { %552 = vmatprep.subr.mxu0 %v44_v10  ;;  %603 = vmatpush3.msra.mxu1 %v295_v36  ;;  %v286_v45 = vld [vmem:[%s950_s3 + $0x10] sm:$0xff]  ;;  %v285_v46 = vld [vmem:[%s950_s3 + $0x8] sm:$0xff]  ;;  %v284_v47 = vld [vmem:[%s950_s3] sm:$0xff] }
  0x11   :  { %553 = vmatpush3.msra.mxu0 %v44_v10  ;;  %604 = vmatprep.subr.mxu1 %v294_v37  ;;  %v859_v48 = vld [vmem:[%s951_s2] ss:$0 sm:$0xff] }
  0x12   :  { %554 = vmatprep.subr.mxu0 %v43_v12  ;;  %605 = vmatpush3.msra.mxu1 %v294_v37 }
  0x13   :  { %555 = vmatpush3.msra.mxu0 %v43_v12  ;;  %606 = vmatprep.subr.mxu1 %v293_v38 }
  0x14   :  { %556 = vmatprep.subr.mxu0 %v42_v13  ;;  %607 = vmatpush3.msra.mxu1 %v293_v38 }
  0x15   :  { %557 = vmatpush3.msra.mxu0 %v42_v13  ;;  %608 = vmatprep.subr.mxu1 %v292_v39 }
  0x16   :  { %558 = vmatprep.subr.mxu0 %v41_v14  ;;  %609 = vmatpush3.msra.mxu1 %v292_v39 }
  0x17   :  { %559 = vmatpush3.msra.mxu0 %v41_v14  ;;  %610 = vmatprep.subr.mxu1 %v291_v40 }
  0x18   :  { %560 = vmatprep.subr.mxu0 %v40_v15  ;;  %611 = vmatpush3.msra.mxu1 %v291_v40 }
  0x19   :  { %561 = vmatpush3.msra.mxu0 %v40_v15  ;;  %612 = vmatprep.subr.mxu1 %v290_v41 }
  0x1a   :  { %562 = vmatprep.subr.mxu0 %v39_v16  ;;  %613 = vmatpush3.msra.mxu1 %v290_v41 }
  0x1b   :  { %563 = vmatpush3.msra.mxu0 %v39_v16  ;;  %614 = vmatprep.subr.mxu1 %v289_v42 }
  0x1c   :  { %564 = vmatprep.subr.mxu0 %v38_v17  ;;  %615 = vmatpush3.msra.mxu1 %v289_v42 }
  0x1d   :  { %565 = vmatpush3.msra.mxu0 %v38_v17  ;;  %616 = vmatprep.subr.mxu1 %v288_v43 }
  0x1e   :  { %566 = vmatprep.subr.mxu0 %v37_v18  ;;  %617 = vmatpush3.msra.mxu1 %v288_v43 }
  0x1f   :  { %567 = vmatpush3.msra.mxu0 %v37_v18  ;;  %618 = vmatprep.subr.mxu1 %v287_v44 }
  0x20   :  { %568 = vmatprep.subr.mxu0 %v36_v19  ;;  %619 = vmatpush3.msra.mxu1 %v287_v44 }
  0x21   :  { %569 = vmatpush3.msra.mxu0 %v36_v19  ;;  %620 = vmatprep.subr.mxu1 %v286_v45 }
  0x22   :  { %571 = vmatmul.mubr.f32.vlgmr.msra.gmra.mxu0 %v21_v20  ;;  %621 = vmatpush3.msra.mxu1 %v286_v45 }
  0x23   :  { %573 = vmatprep.mubr.f32.mxu0 %v22_v21  ;;  %622 = vmatprep.subr.mxu1 %v285_v46 }
  0x24   :  { %623 = vmatpush3.msra.mxu1 %v285_v46 }
  0x25   :  { %624 = vmatprep.subr.mxu1 %v284_v47 }
  0x26   :  { %574 = vmatmul.mubr.f32.gmra.mxu0 %v23_v22  ;;  %625 = vmatpush3.msra.mxu1 %v284_v47 }
  0x27   :  { %576 = vmatprep.mubr.f32.mxu0 %v24_v23 }
  0x2a   :  { %577 = vmatmul.mubr.f32.gmra.mxu0 %v25_v24 }
  0x2b   :  { %579 = vmatprep.mubr.f32.mxu0 %v26_v25 }
  0x2e   :  { %580 = vmatmul.mubr.f32.gmra.mxu0 %v27_v26 }
  0x2f   :  { %582 = vmatprep.mubr.f32.mxu0 %v28_v27 }
  0x32   :  { %583 = vmatmul.mubr.f32.gmra.mxu0 %v29_v28 }
  0x33   :  { %585 = vmatprep.mubr.f32.mxu0 %v30_v29 }
  0x36   :  { %586 = vmatmul.mubr.f32.gmra.mxu0 %v31_v30 }
  0x37   :  { %588 = vmatprep.mubr.f32.mxu0 %v32_v31 }
  0x3a   :  { %589 = vmatmul.mubr.f32.gmra.mxu0 %v33_v32 }
  0x3b   :  { %591 = vmatprep.mubr.f32.mxu0 %v34_v33 }
  0x3e   :  { %592 = vmatmul.mubr.f32.gmra.mxu0 %v35_v34 }
  0xe2   :  { %v572_v49 = vpop.f32.mrf.mxu0 }
  0xe3   :  { %v131_v50 = vadd.f32 %v572_v49, %v859_v48 }
  0xe4   :  { %v125_v51 = vpop.f32.mrf.mxu0 }
  0xe5   :  { %v221_v52 = vmul.f32 0.70710677, %v131_v50  ;;  %v126_v53 = vadd.f32 %v859_v48, %v125_v51  ;;  %v205_v21 = vmul.f32 0.5, %v131_v50 }
  0xe6   :  { %v575_v54 = vpop.f32.mrf.mxu0 }
  0xe7   :  { %650 = verf.f32 %v221_v52  ;;  %v220_v55 = vmul.f32 0.70710677, %v126_v53  ;;  %v141_v56 = vadd.f32 %v575_v54, %v859_v48  ;;  %v204_v23 = vmul.f32 0.5, %v126_v53 }
  0xe8   :  { %v135_v57 = vpop.f32.mrf.mxu0 }
  0xe9   :  { %652 = verf.f32 %v220_v55  ;;  %v223_v58 = vmul.f32 0.70710677, %v141_v56  ;;  %v136_v59 = vadd.f32 %v859_v48, %v135_v57  ;;  %v207_v38 = vmul.f32 0.5, %v141_v56 }
  0xea   :  { %v578_v60 = vpop.f32.mrf.mxu0 }
  0xeb   :  { %654 = verf.f32 %v223_v58  ;;  %v222_v61 = vmul.f32 0.70710677, %v136_v59  ;;  %v151_v62 = vadd.f32 %v578_v60, %v859_v48  ;;  %v206_v35 = vmul.f32 0.5, %v136_v59 }
  0xec   :  { %v145_v63 = vpop.f32.mrf.mxu0 }
  0xed   :  { %656 = verf.f32 %v222_v61  ;;  %v225_v0 = vmul.f32 0.70710677, %v151_v62  ;;  %v146_v1 = vadd.f32 %v859_v48, %v145_v63  ;;  %v209_v50 = vmul.f32 0.5, %v151_v62 }
  0xee   :  { %v581_v2 = vpop.f32.mrf.mxu0 }
  0xef   :  { %658 = verf.f32 %v225_v0  ;;  %v224_v3 = vmul.f32 0.70710677, %v146_v1  ;;  %v868_v4 = vadd.f32 %v581_v2, %v859_v48  ;;  %v208_v51 = vmul.f32 0.5, %v146_v1 }
  0xf0   :  { %v155_v5 = vpop.f32.mrf.mxu0 }
  0xf1   :  { %660 = verf.f32 %v224_v3  ;;  %v227_v6 = vmul.f32 0.70710677, %v868_v4  ;;  %v156_v7 = vadd.f32 %v859_v48, %v155_v5  ;;  %v211_v62 = vmul.f32 0.5, %v868_v4 }
  0xf2   :  { %v584_v8 = vpop.f32.mrf.mxu0 }
  0xf3   :  { %662 = verf.f32 %v227_v6  ;;  %v226_v9 = vmul.f32 0.70710677, %v156_v7  ;;  %v873_v10 = vadd.f32 %v584_v8, %v859_v48  ;;  %v210_v57 = vmul.f32 0.5, %v156_v7 }
  0xf4   :  { %v651_v11 = vpop.eup %650  ;;  %v165_v12 = vpop.f32.mrf.mxu0 }
  0xf5   :  { %664 = verf.f32 %v226_v9  ;;  %v229_v13 = vmul.f32 0.70710677, %v873_v10  ;;  %v877_v14 = vadd.f32 %v859_v48, %v165_v12  ;;  %v253_v17 = vadd.f32 1.0, %v651_v11 }
  0xf6   :  { %v653_v15 = vpop.eup %652  ;;  %v587_v16 = vpop.f32.mrf.mxu0  ;;  %v213_v8 = vmul.f32 0.5, %v873_v10 }
  0xf7   :  { %666 = verf.f32 %v229_v13  ;;  %v228_v18 = vmul.f32 0.70710677, %v877_v14  ;;  %v881_v19 = vadd.f32 %v587_v16, %v859_v48  ;;  %v252_v24 = vadd.f32 1.0, %v653_v15 }
  0xf8   :  { %v655_v20 = vpop.eup %654  ;;  %v175_v22 = vpop.f32.mrf.mxu0  ;;  %v269_v30 = vmul.f32 %v253_v17, %v205_v21  ;;  %v212_v3 = vmul.f32 0.5, %v877_v14 }
  0xf9   :  { %668 = verf.f32 %v228_v18  ;;  %v231_v25 = vmul.f32 0.70710677, %v881_v19  ;;  %v176_v26 = vadd.f32 %v859_v48, %v175_v22  ;;  %v268_v29 = vmul.f32 %v252_v24, %v204_v23 }
  0xfa   :  { %v657_v27 = vpop.eup %656  ;;  %v590_v28 = vpop.f32.mrf.mxu0  ;;  %v255_v33 = vadd.f32 1.0, %v655_v20  ;;  %v215_v17 = vmul.f32 0.5, %v881_v19 }
  0xfb   :  { %670 = verf.f32 %v231_v25  ;;  %v230_v31 = vmul.f32 0.70710677, %v176_v26  ;;  %v886_v32 = vadd.f32 %v590_v28, %v859_v48  ;;  %626 = vmatprep.mubr.f32.mxu1 %v268_v29  ;;  %v254_v37 = vadd.f32 1.0, %v657_v27 }
  0xfc   :  { %v659_v34 = vpop.eup %658  ;;  %v185_v36 = vpop.f32.mrf.mxu0  ;;  %627 = vmatmul.mubr.f32.vlgmr.msra.gmra.mxu1 %v269_v30  ;;  %v271_v47 = vmul.f32 %v255_v33, %v207_v38  ;;  %v214_v12 = vmul.f32 0.5, %v176_v26 }
  0xfd   :  { %672 = verf.f32 %v230_v31  ;;  %v233_v39 = vmul.f32 0.70710677, %v886_v32  ;;  %v186_v40 = vadd.f32 %v859_v48, %v185_v36  ;;  %v270_v43 = vmul.f32 %v254_v37, %v206_v35 }
  0xfe   :  { %v661_v41 = vpop.eup %660  ;;  %v593_v42 = vpop.f32.mrf.mxu0  ;;  %v257_v44 = vadd.f32 1.0, %v659_v34  ;;  %v217_v24 = vmul.f32 0.5, %v886_v32  ;;  %v473_v34 = vld [vmem:[%s952_s4] ss:$0 sm:$0xff] }
  0xff   :  { %674 = verf.f32 %v233_v39  ;;  %v232_v45 = vmul.f32 0.70710677, %v186_v40  ;;  %v201_v46 = vadd.f32 %v593_v42, %v859_v48  ;;  %629 = vmatprep.mubr.f32.mxu1 %v270_v43  ;;  %v256_v53 = vadd.f32 1.0, %v661_v41 }
 0x100   :  { %v663_v49 = vpop.eup %662  ;;  %v195_v52 = vpop.f32.mrf.mxu0  ;;  %630 = vmatmul.mubr.f32.gmra.mxu1 %v271_v47  ;;  %v273_v59 = vmul.f32 %v257_v44, %v209_v50  ;;  %v216_v20 = vmul.f32 0.5, %v186_v40 }
 0x101   :  { %676 = verf.f32 %v232_v45  ;;  %v235_v54 = vmul.f32 0.70710677, %v201_v46  ;;  %v196_v55 = vadd.f32 %v859_v48, %v195_v52  ;;  %v272_v58 = vmul.f32 %v256_v53, %v208_v51 }
 0x102   :  { %v665_v56 = vpop.eup %664  ;;  %v259_v63 = vadd.f32 1.0, %v663_v49  ;;  %v219_v19 = vmul.f32 0.5, %v201_v46 }
 0x103   :  { %678 = verf.f32 %v235_v54  ;;  %v234_v60 = vmul.f32 0.70710677, %v196_v55  ;;  %v258_v61 = vadd.f32 1.0, %v665_v56  ;;  %632 = vmatprep.mubr.f32.mxu1 %v272_v58  ;;  %v218_v27 = vmul.f32 0.5, %v196_v55 }
 0x104   :  { %v667_v0 = vpop.eup %666  ;;  %633 = vmatmul.mubr.f32.gmra.mxu1 %v273_v59  ;;  %v275_v48 = vmul.f32 %v259_v63, %v211_v62 }
 0x105   :  { %680 = verf.f32 %v234_v60  ;;  %v274_v1 = vmul.f32 %v258_v61, %v210_v57  ;;  %v261_v6 = vadd.f32 1.0, %v667_v0 }
 0x106   :  { %v669_v2 = vpop.eup %668 }
 0x107   :  { %635 = vmatprep.mubr.f32.mxu1 %v274_v1  ;;  %v260_v5 = vadd.f32 1.0, %v669_v2  ;;  %v277_v13 = vmul.f32 %v261_v6, %v213_v8 }
 0x108   :  { %v671_v7 = vpop.eup %670  ;;  %636 = vmatmul.mubr.f32.gmra.mxu1 %v275_v48 }
 0x109   :  { %v276_v9 = vmul.f32 %v260_v5, %v212_v3  ;;  %v263_v15 = vadd.f32 1.0, %v671_v7 }
 0x10a   :  { %v673_v11 = vpop.eup %672 }
 0x10b   :  { %638 = vmatprep.mubr.f32.mxu1 %v276_v9  ;;  %v262_v4 = vadd.f32 1.0, %v673_v11  ;;  %v279_v21 = vmul.f32 %v263_v15, %v215_v17 }
 0x10c   :  { %v675_v16 = vpop.eup %674  ;;  %639 = vmatmul.mubr.f32.gmra.mxu1 %v277_v13 }
 0x10d   :  { %v278_v14 = vmul.f32 %v262_v4, %v214_v12  ;;  %v265_v23 = vadd.f32 1.0, %v675_v16 }
 0x10e   :  { %v677_v18 = vpop.eup %676 }
 0x10f   :  { %641 = vmatprep.mubr.f32.mxu1 %v278_v14  ;;  %v264_v22 = vadd.f32 1.0, %v677_v18  ;;  %v281_v28 = vmul.f32 %v265_v23, %v217_v24 }
 0x110   :  { %v679_v10 = vpop.eup %678  ;;  %642 = vmatmul.mubr.f32.gmra.mxu1 %v279_v21 }
 0x111   :  { %v280_v25 = vmul.f32 %v264_v22, %v216_v20  ;;  %v267_v30 = vadd.f32 1.0, %v679_v10 }
 0x112   :  { %v681_v26 = vpop.eup %680 }
 0x113   :  { %644 = vmatprep.mubr.f32.mxu1 %v280_v25  ;;  %v266_v29 = vadd.f32 1.0, %v681_v26  ;;  %v283_v33 = vmul.f32 %v267_v30, %v219_v19 }
 0x114   :  { %645 = vmatmul.mubr.f32.gmra.mxu1 %v281_v28 }
 0x115   :  { %v282_v31 = vmul.f32 %v266_v29, %v218_v27 }
 0x117   :  { %647 = vmatprep.mubr.f32.mxu1 %v282_v31 }
 0x118   :  { %648 = vmatmul.mubr.f32.gmra.mxu1 %v283_v33 }
 0x1bc   :  { %v628_v35 = vpop.f32.mrf.mxu1 }
 0x1bd   :  { %v379_v32 = vadd.f32 %v628_v35, %v473_v34 }
 0x1be   :  { %v373_v36 = vpop.f32.mrf.mxu1 }
 0x1bf   :  { %453 = vst [vmem:[%s953_s5 + $0x8] sm:$0xff] %v379_v32  ;;  %v374_v37 = vadd.f32 %v473_v34, %v373_v36 }
 0x1c0   :  { %v631_v38 = vpop.f32.mrf.mxu1 }
 0x1c1   :  { %452 = vst [vmem:[%s953_s5] sm:$0xff] %v374_v37  ;;  %v389_v39 = vadd.f32 %v631_v38, %v473_v34 }
 0x1c2   :  { %v383_v40 = vpop.f32.mrf.mxu1 }
 0x1c3   :  { %455 = vst [vmem:[%s953_s5 + $0x18] sm:$0xff] %v389_v39  ;;  %v384_v41 = vadd.f32 %v473_v34, %v383_v40 }
 0x1c4   :  { %v634_v42 = vpop.f32.mrf.mxu1 }
 0x1c5   :  { %454 = vst [vmem:[%s953_s5 + $0x10] sm:$0xff] %v384_v41  ;;  %v399_v43 = vadd.f32 %v634_v42, %v473_v34 }
 0x1c6   :  { %v393_v44 = vpop.f32.mrf.mxu1 }
 0x1c7   :  { %457 = vst [vmem:[%s953_s5 + $0x28] sm:$0xff] %v399_v43  ;;  %v394_v45 = vadd.f32 %v473_v34, %v393_v44 }
 0x1c8   :  { %v637_v46 = vpop.f32.mrf.mxu1 }
 0x1c9   :  { %456 = vst [vmem:[%s953_s5 + $0x20] sm:$0xff] %v394_v45  ;;  %v409_v47 = vadd.f32 %v637_v46, %v473_v34 }
 0x1ca   :  { %v403_v49 = vpop.f32.mrf.mxu1 }
 0x1cb   :  { %459 = vst [vmem:[%s953_s5 + $0x38] sm:$0xff] %v409_v47  ;;  %v404_v50 = vadd.f32 %v473_v34, %v403_v49 }
 0x1cc   :  { %v640_v51 = vpop.f32.mrf.mxu1 }
 0x1cd   :  { %458 = vst [vmem:[%s953_s5 + $0x30] sm:$0xff] %v404_v50  ;;  %v419_v52 = vadd.f32 %v640_v51, %v473_v34 }
 0x1ce   :  { %v413_v53 = vpop.f32.mrf.mxu1 }
 0x1cf   :  { %461 = vst [vmem:[%s953_s5 + $0x48] sm:$0xff] %v419_v52  ;;  %v414_v54 = vadd.f32 %v473_v34, %v413_v53 }
 0x1d0   :  { %v643_v55 = vpop.f32.mrf.mxu1 }
 0x1d1   :  { %460 = vst [vmem:[%s953_s5 + $0x40] sm:$0xff] %v414_v54  ;;  %v429_v56 = vadd.f32 %v643_v55, %v473_v34 }
 0x1d2   :  { %v423_v57 = vpop.f32.mrf.mxu1 }
 0x1d3   :  { %463 = vst [vmem:[%s953_s5 + $0x58] sm:$0xff] %v429_v56  ;;  %v424_v58 = vadd.f32 %v473_v34, %v423_v57 }
 0x1d4   :  { %v646_v59 = vpop.f32.mrf.mxu1 }
 0x1d5   :  { %462 = vst [vmem:[%s953_s5 + $0x50] sm:$0xff] %v424_v58  ;;  %v439_v60 = vadd.f32 %v646_v59, %v473_v34 }
 0x1d6   :  { %v433_v61 = vpop.f32.mrf.mxu1 }
 0x1d7   :  { %465 = vst [vmem:[%s953_s5 + $0x68] sm:$0xff] %v439_v60  ;;  %v434_v63 = vadd.f32 %v473_v34, %v433_v61 }
 0x1d8   :  { %v649_v0 = vpop.f32.mrf.mxu1 }
 0x1d9   :  { %464 = vst [vmem:[%s953_s5 + $0x60] sm:$0xff] %v434_v63  ;;  %v449_v62 = vadd.f32 %v649_v0, %v473_v34 }
 0x1da   :  { %v443_v1 = vpop.f32.mrf.mxu1 }
 0x1db   :  { %467 = vst [vmem:[%s953_s5 + $0x78] sm:$0xff] %v449_v62  ;;  %v444_v2 = vadd.f32 %v473_v34, %v443_v1 }
 0x1dd   :  { %466 = vst [vmem:[%s953_s5 + $0x70] sm:$0xff] %v444_v2 }

</bundles_post_ra>
